<compile_context>
chip_gen: v6e
topology: v6e:2x2x1
jax: 0.10.0
libtpu: 0.0.40
codegen_flags: <defaults>
</compile_context>

<pallas_src>
import functools

import jax
import jax.numpy as jnp
from jax import lax
from jax.experimental import pallas as pl
from jax.experimental.pallas import tpu as pltpu


def _bce_dice_focal_kernel(x_ref, t_ref, acc_ref, *, gamma, nblk, n_valid,
                           guard_tail, approx_recip):
    """One (B, tr, 128) chunk -> partial row-sums in acc_ref (3, B, 128).

    acc_ref[0] = sum_rows (1 - pt)**gamma * bce      (alpha applied in wrapper)
    acc_ref[1] = sum_rows sigmoid(x) * t             (dice intersection)
    acc_ref[2] = sum_rows sigmoid(x) + t             (dice denominator)
    Lanes are reduced once, outside the kernel, on the tiny result.
    """
    k = pl.program_id(1)
    blk = pl.program_id(0) * pl.num_programs(1) + k

    @pl.when(k == 0)
    def _init():
        acc_ref[...] = jnp.zeros_like(acc_ref)

    def _accumulate():
        x = x_ref[...].astype(jnp.float32)            # (B, tr, 128)
        t = t_ref[...].astype(jnp.float32)

        if n_valid is not None:
            # Neutralise elements past N: covers the ragged 128-lane tail and
            # the trailing rows of a partial last block (unspecified VMEM data).
            tr = x_ref.shape[1]
            rows = lax.broadcasted_iota(jnp.int32, (tr, 128), 0)
            lanes = lax.broadcasted_iota(jnp.int32, (tr, 128), 1)
            idx = (blk * tr + rows) * 128 + lanes
            valid = (idx < n_valid)[None, :, :]
            x = jnp.where(valid, x, -1e4)             # exp(-1e4) == 0 exactly
            t = jnp.where(valid, t, 0.0)

        e = jnp.exp(-jnp.abs(x))                      # one EUP exp / element
        s = 1.0 + e                                   # shared by log and recip
        # Numerically stable BCE-with-logits (== F.binary_cross_entropy_with_logits)
        bce = jnp.maximum(x, 0.0) - x * t + jnp.log(s)

        r = pl.reciprocal(s, approx=approx_recip)     # EUP vrcp (nearly free)
        p = jnp.where(x >= 0.0, r, e * r)             # sigmoid(x)

        tp = t * p                                    # intersection term
        sp = t + p                                    # dice-denominator term
        # 1 - pt with pt = t*p + (1-t)*(1-p)  (== exp(-bce) for binary targets)
        one_minus_pt = sp - 2.0 * tp

        gi = int(gamma)
        if float(gamma) == float(gi) and 0 <= gi <= 8:
            if gi == 0:
                wg = jnp.ones_like(one_minus_pt)
            else:
                wg = one_minus_pt
                for _ in range(gi - 1):               # pow -> repeated multiply
                    wg = wg * one_minus_pt
        else:
            wg = one_minus_pt ** jnp.float32(gamma)

        # Reduce the row (sublane) axis only; lanes are reduced in the wrapper
        # on the tiny (ncores, 3, B, 128) result.
        acc_ref[0] += jnp.sum(wg * bce, axis=1)       # (B, 128)
        acc_ref[1] += jnp.sum(tp, axis=1)
        acc_ref[2] += jnp.sum(sp, axis=1)

    if guard_tail:
        pl.when(blk < nblk)(_accumulate)              # skip clamped tail step
    else:
        _accumulate()


def bce_dice_focal_loss(inputs, targets, *, alpha=1.0, gamma=2.0,
                        focal_weight=0.5, approx_sigmoid=True):
    """inputs: raw logits (any float dtype); targets: binary masks. Scalar f32."""
    assert inputs.shape == targets.shape
    B = inputs.shape[0]
    N = 1
    for d in inputs.shape[1:]:
        N *= d

    # ---- glue (free reshapes): flatten to [B, N], then [B, R, 128]. ----
    x2 = inputs.reshape(B, N)
    t2 = targets.reshape(B, N)
    R = pl.cdiv(N, 128)
    lane_pad = R * 128 - N
    if lane_pad:
        # Only pad to the next multiple of 128 (<=127 elems/sample), with a
        # neutral logit so padded elements contribute exact zeros to every sum.
        x2 = jnp.pad(x2, ((0, 0), (0, lane_pad)), constant_values=-1e4)
        t2 = jnp.pad(t2, ((0, 0), (0, lane_pad)), constant_values=0)
    x3 = x2.reshape(B, R, 128)
    t3 = t2.reshape(B, R, 128)

    # ---- block sizing: ~1 MiB of input per block (by true itemsize), rows
    # rounded to a multiple of 8 sublanes (full R when it fits in one block).
    # NOTE: for very large B (>~2048) the 8-row floor grows the block; tile B
    # onto the grid if that ever becomes a real use case.
    itemsize = max(jnp.dtype(inputs.dtype).itemsize,
                   jnp.dtype(targets.dtype).itemsize)
    budget_rows = max(8, (((1 << 20) // itemsize) // (B * 128)) // 8 * 8)
    tr = R if R <= budget_rows else budget_rows
    nblk = pl.cdiv(R, tr)

    # 2-way core split: helps v7x (2 TCs); on 1-TC chips it costs at most one
    # skipped grid step and never shrinks the block.
    ncores = 2 if nblk >= 2 else 1
    nsteps = pl.cdiv(nblk, ncores)
    guard_tail = (ncores * nsteps) != nblk
    # Validity mask only needed when the last row-block is partial (its trailing
    # rows read unspecified data); the 128-lane pad is already neutral.
    need_mask = (R % tr) != 0

    kernel = functools.partial(
        _bce_dice_focal_kernel,
        gamma=float(gamma), nblk=nblk,
        n_valid=(N if need_mask else None),
        guard_tail=guard_tail, approx_recip=bool(approx_sigmoid))

    def in_map(c, k):
        # Clamp so the (possible) tail step stays in bounds; the kernel skips
        # its accumulation via pl.when.
        return (0, jnp.minimum(c * nsteps + k, nblk - 1), 0)

    parts = pl.pallas_call(
        kernel,
        out_shape=jax.ShapeDtypeStruct((ncores, 3, B, 128), jnp.float32),
        grid_spec=pltpu.PrefetchScalarGridSpec(
            num_scalar_prefetch=0,
            grid=(ncores, nsteps),
            in_specs=[
                pl.BlockSpec((B, tr, 128), in_map),
                pl.BlockSpec((B, tr, 128), in_map),
            ],
            # Per-core output block, constant across the reduction axis, so it
            # stays resident in VMEM and doubles as the accumulator.
            out_specs=pl.BlockSpec((None, 3, B, 128), lambda c, k: (c, 0, 0, 0)),
        ),
        compiler_params=pltpu.CompilerParams(
            dimension_semantics=("parallel", "arbitrary"),
            vmem_limit_bytes=32 * 1024 * 1024,        # safe on v5e/v6e/v7x
        ),
    )(x3, t3)

    # ---- tiny final combine in plain JAX (a few KB of data). ----
    sums = jnp.sum(parts, axis=(0, 3))                # (3, B)
    focal_mean = float(alpha) * jnp.sum(sums[0]) / float(B * N)
    smooth = 1e-5
    dice = (2.0 * sums[1] + smooth) / (sums[2] + smooth)
    return focal_weight * focal_mean + (1.0 - jnp.mean(dice))


def _reference(inputs, targets, alpha=1.0, gamma=2.0, focal_weight=0.5):
    """Pure-JAX mirror of the PyTorch BCEDiceFocalLoss.forward."""
    x = inputs.astype(jnp.float32)
    t = targets.astype(jnp.float32)
    bce = jnp.maximum(x, 0.0) - x * t + jnp.log1p(jnp.exp(-jnp.abs(x)))
    pt = jnp.exp(-bce)
    focal = (alpha * (1.0 - pt) ** gamma * bce).mean()
    smooth = 1e-5
    p = jax.nn.sigmoid(x).reshape(x.shape[0], -1)
    tf = t.reshape(t.shape[0], -1)
    dice = (2.0 * (p * tf).sum(1) + smooth) / (p.sum(1) + tf.sum(1) + smooth)
    return focal_weight * focal + (1.0 - dice.mean())


if __name__ == "__main__":
    key = jax.random.PRNGKey(0)
    k1, k2 = jax.random.split(key)

    # Small shape consistent with the module (single-block, aligned path).
    B, C, H, W = 2, 4, 16, 16
    logits = jax.random.normal(k1, (B, C, H, W), dtype=jnp.float32) * 2.0
    masks = (jax.random.uniform(k2, (B, C, H, W)) > 0.5).astype(jnp.float32)
    loss = jax.block_until_ready(
        bce_dice_focal_loss(logits, masks, alpha=1.0, gamma=2.0, focal_weight=0.5))
    ref = _reference(logits, masks)
    # Tolerance covers the approximate EUP reciprocal used for the sigmoid.
    assert jnp.allclose(loss, ref, rtol=2e-3, atol=2e-3), (loss, ref)

    # Ragged / multi-block path: exercises the 128-lane pad, the in-kernel
    # validity mask, the clamped tail step and the 2-way core split.
    k3, k4 = jax.random.split(k2)
    B2, C2, H2, W2 = 2, 4, 300, 300                    # N = 360000 (not % 128)
    logits2 = jax.random.normal(k3, (B2, C2, H2, W2), dtype=jnp.float32) * 2.0
    masks2 = (jax.random.uniform(k4, (B2, C2, H2, W2)) > 0.5).astype(jnp.float32)
    loss2 = jax.block_until_ready(bce_dice_focal_loss(logits2, masks2))
    ref2 = _reference(logits2, masks2)
    assert jnp.allclose(loss2, ref2, rtol=3e-3, atol=3e-3), (loss2, ref2)

    print("KERNEL_OK")
</pallas_src>

<mosaic_0001>
module attributes {stable_mosaic.version = 11 : i64} {
  func.func @_bce_dice_focal_kernel(%arg0: i32, %arg1: i32, %arg2: memref<2x8x128xf32, #tpu.memory_space<vmem>>, %arg3: memref<2x8x128xf32, #tpu.memory_space<vmem>>, %arg4: memref<1x3x2x128xf32, #tpu.memory_space<vmem>>) attributes {dimension_semantics = [#tpu.dimension_semantics<parallel>, #tpu.dimension_semantics<arbitrary>], iteration_bounds = array<i64: 1, 1>, scalar_prefetch = 0 : i64, scratch_operands = 0 : i64, tpu.core_type = #tpu.core_type<tc>, window_params = [{transform_indices = @transform_0, window_bounds = array<i64: 2, 8, 128>}, {transform_indices = @transform_1, window_bounds = array<i64: 2, 8, 128>}, {transform_indices = @transform_2, window_bounds = array<i64: 1, 3, 2, 128>}]} {
    %c0_i32 = arith.constant 0 : i32
    %0 = arith.cmpi eq, %arg1, %c0_i32 : i32
    %1 = arith.extui %0 : i1 to i32
    %c0_i32_0 = arith.constant 0 : i32
    %2 = arith.cmpi ne, %1, %c0_i32_0 : i32
    scf.if %2 {
      %cst_35 = arith.constant 0.000000e+00 : f32
      %50 = vector.broadcast %cst_35 : f32 to vector<3x2x128xf32>
      %c0_36 = arith.constant 0 : index
      %c0_37 = arith.constant 0 : index
      %c0_38 = arith.constant 0 : index
      %c0_39 = arith.constant 0 : index
      %51 = vector.load %arg4[%c0_36, %c0_37, %c0_38, %c0_39] : memref<1x3x2x128xf32, #tpu.memory_space<vmem>>, vector<1x3x2x128xf32>
      %52 = vector.shape_cast %51 : vector<1x3x2x128xf32> to vector<3x2x128xf32>
      %53 = vector.shape_cast %50 : vector<3x2x128xf32> to vector<1x3x2x128xf32>
      tpu.vector_store %arg4[%c0_36, %c0_37, %c0_38, %c0_39], %53 {strides = array<i32>} : memref<1x3x2x128xf32, #tpu.memory_space<vmem>>, vector<1x3x2x128xf32>,
    } else {
    }
    %c0 = arith.constant 0 : index
    %c0_1 = arith.constant 0 : index
    %c0_2 = arith.constant 0 : index
    %3 = vector.load %arg2[%c0, %c0_1, %c0_2] : memref<2x8x128xf32, #tpu.memory_space<vmem>>, vector<2x8x128xf32>
    %c0_3 = arith.constant 0 : index
    %c0_4 = arith.constant 0 : index
    %c0_5 = arith.constant 0 : index
    %4 = vector.load %arg3[%c0_3, %c0_4, %c0_5] : memref<2x8x128xf32, #tpu.memory_space<vmem>>, vector<2x8x128xf32>
    %5 = math.absf %3 : vector<2x8x128xf32>
    %cst = arith.constant 0.000000e+00 : f32
    %6 = vector.broadcast %cst : f32 to vector<2x8x128xf32>
    %7 = arith.subf %6, %5 : vector<2x8x128xf32>
    %8 = math.exp %7 : vector<2x8x128xf32>
    %cst_6 = arith.constant 1.000000e+00 : f32
    %9 = vector.broadcast %cst_6 : f32 to vector<2x8x128xf32>
    %10 = arith.addf %9, %8 : vector<2x8x128xf32>
    %cst_7 = arith.constant 0.000000e+00 : f32
    %11 = vector.broadcast %cst_7 : f32 to vector<2x8x128xf32>
    %12 = arith.maximumf %3, %11 : vector<2x8x128xf32>
    %13 = arith.mulf %3, %4 : vector<2x8x128xf32>
    %14 = arith.subf %12, %13 : vector<2x8x128xf32>
    %15 = math.log %10 : vector<2x8x128xf32>
    %16 = arith.addf %14, %15 : vector<2x8x128xf32>
    %17 = tpu.reciprocal %10 {approx = true} : vector<2x8x128xf32> -> vector<2x8x128xf32>
    %cst_8 = arith.constant 0.000000e+00 : f32
    %18 = vector.broadcast %cst_8 : f32 to vector<2x8x128xf32>
    %19 = arith.cmpf oge, %3, %18 : vector<2x8x128xf32>
    %20 = arith.mulf %8, %17 : vector<2x8x128xf32>
    %21 = arith.select %19, %17, %20 : vector<2x8x128xi1>, vector<2x8x128xf32>
    %22 = arith.mulf %4, %21 : vector<2x8x128xf32>
    %23 = arith.addf %4, %21 : vector<2x8x128xf32>
    %cst_9 = arith.constant 2.000000e+00 : f32
    %24 = vector.broadcast %cst_9 : f32 to vector<2x8x128xf32>
    %25 = arith.mulf %24, %22 : vector<2x8x128xf32>
    %26 = arith.subf %23, %25 : vector<2x8x128xf32>
    %27 = arith.mulf %26, %26 : vector<2x8x128xf32>
    %c0_10 = arith.constant 0 : index
    %c0_11 = arith.constant 0 : index
    %c0_12 = arith.constant 0 : index
    %c0_13 = arith.constant 0 : index
    %28 = vector.load %arg4[%c0_10, %c0_11, %c0_12, %c0_13] : memref<1x3x2x128xf32, #tpu.memory_space<vmem>>, vector<1x1x2x128xf32>
    %29 = vector.shape_cast %28 : vector<1x1x2x128xf32> to vector<2x128xf32>
    %30 = arith.mulf %27, %16 : vector<2x8x128xf32>
    %cst_14 = arith.constant dense<0.000000e+00> : vector<2x128xf32>
    %31 = vector.multi_reduction <add>, %30, %cst_14 [1] : vector<2x8x128xf32> to vector<2x128xf32>
    %32 = arith.addf %29, %31 : vector<2x128xf32>
    %c0_15 = arith.constant 0 : index
    %c0_16 = arith.constant 0 : index
    %c0_17 = arith.constant 0 : index
    %c0_18 = arith.constant 0 : index
    %33 = vector.load %arg4[%c0_15, %c0_16, %c0_17, %c0_18] : memref<1x3x2x128xf32, #tpu.memory_space<vmem>>, vector<1x1x2x128xf32>
    %34 = vector.shape_cast %33 : vector<1x1x2x128xf32> to vector<2x128xf32>
    %35 = vector.shape_cast %32 : vector<2x128xf32> to vector<1x1x2x128xf32>
    tpu.vector_store %arg4[%c0_15, %c0_16, %c0_17, %c0_18], %35 {strides = array<i32>} : memref<1x3x2x128xf32, #tpu.memory_space<vmem>>, vector<1x1x2x128xf32>,
    %c0_19 = arith.constant 0 : index
    %c1 = arith.constant 1 : index
    %c0_20 = arith.constant 0 : index
    %c0_21 = arith.constant 0 : index
    %36 = vector.load %arg4[%c0_19, %c1, %c0_20, %c0_21] : memref<1x3x2x128xf32, #tpu.memory_space<vmem>>, vector<1x1x2x128xf32>
    %37 = vector.shape_cast %36 : vector<1x1x2x128xf32> to vector<2x128xf32>
    %cst_22 = arith.constant dense<0.000000e+00> : vector<2x128xf32>
    %38 = vector.multi_reduction <add>, %22, %cst_22 [1] : vector<2x8x128xf32> to vector<2x128xf32>
    %39 = arith.addf %37, %38 : vector<2x128xf32>
    %c0_23 = arith.constant 0 : index
    %c1_24 = arith.constant 1 : index
    %c0_25 = arith.constant 0 : index
    %c0_26 = arith.constant 0 : index
    %40 = vector.load %arg4[%c0_23, %c1_24, %c0_25, %c0_26] : memref<1x3x2x128xf32, #tpu.memory_space<vmem>>, vector<1x1x2x128xf32>
    %41 = vector.shape_cast %40 : vector<1x1x2x128xf32> to vector<2x128xf32>
    %42 = vector.shape_cast %39 : vector<2x128xf32> to vector<1x1x2x128xf32>
    tpu.vector_store %arg4[%c0_23, %c1_24, %c0_25, %c0_26], %42 {strides = array<i32>} : memref<1x3x2x128xf32, #tpu.memory_space<vmem>>, vector<1x1x2x128xf32>,
    %c0_27 = arith.constant 0 : index
    %c2 = arith.constant 2 : index
    %c0_28 = arith.constant 0 : index
    %c0_29 = arith.constant 0 : index
    %43 = vector.load %arg4[%c0_27, %c2, %c0_28, %c0_29] : memref<1x3x2x128xf32, #tpu.memory_space<vmem>>, vector<1x1x2x128xf32>
    %44 = vector.shape_cast %43 : vector<1x1x2x128xf32> to vector<2x128xf32>
    %cst_30 = arith.constant dense<0.000000e+00> : vector<2x128xf32>
    %45 = vector.multi_reduction <add>, %23, %cst_30 [1] : vector<2x8x128xf32> to vector<2x128xf32>
    %46 = arith.addf %44, %45 : vector<2x128xf32>
    %c0_31 = arith.constant 0 : index
    %c2_32 = arith.constant 2 : index
    %c0_33 = arith.constant 0 : index
    %c0_34 = arith.constant 0 : index
    %47 = vector.load %arg4[%c0_31, %c2_32, %c0_33, %c0_34] : memref<1x3x2x128xf32, #tpu.memory_space<vmem>>, vector<1x1x2x128xf32>
    %48 = vector.shape_cast %47 : vector<1x1x2x128xf32> to vector<2x128xf32>
    %49 = vector.shape_cast %46 : vector<2x128xf32> to vector<1x1x2x128xf32>
    tpu.vector_store %arg4[%c0_31, %c2_32, %c0_33, %c0_34], %49 {strides = array<i32>} : memref<1x3x2x128xf32, #tpu.memory_space<vmem>>, vector<1x1x2x128xf32>,
    return
  }
  func.func @transform_0(%arg0: i32, %arg1: i32) -> (i32, i32, i32) {
    %c1_i32 = arith.constant 1 : i32
    %0 = arith.muli %arg0, %c1_i32 : i32
    %1 = arith.addi %0, %arg1 : i32
    %c0_i32 = arith.constant 0 : i32
    %2 = arith.minsi %1, %c0_i32 : i32
    %c0_i32_0 = arith.constant 0 : i32
    %c0_i32_1 = arith.constant 0 : i32
    %c0_i32_2 = arith.constant 0 : i32
    return %c0_i32_0, %2, %c0_i32_1 : i32, i32, i32
  }
  func.func @transform_1(%arg0: i32, %arg1: i32) -> (i32, i32, i32) {
    %c1_i32 = arith.constant 1 : i32
    %0 = arith.muli %arg0, %c1_i32 : i32
    %1 = arith.addi %0, %arg1 : i32
    %c0_i32 = arith.constant 0 : i32
    %2 = arith.minsi %1, %c0_i32 : i32
    %c0_i32_0 = arith.constant 0 : i32
    %c0_i32_1 = arith.constant 0 : i32
    %c0_i32_2 = arith.constant 0 : i32
    return %c0_i32_0, %2, %c0_i32_1 : i32, i32, i32
  }
  func.func @transform_2(%arg0: i32, %arg1: i32) -> (i32, i32, i32, i32) {
    %c0_i32 = arith.constant 0 : i32
    %c0_i32_0 = arith.constant 0 : i32
    %c0_i32_1 = arith.constant 0 : i32
    %c0_i32_2 = arith.constant 0 : i32
    return %arg0, %c0_i32, %c0_i32_0, %c0_i32_1 : i32, i32, i32, i32
  }
}

</mosaic_0001>

<bundles_post_ra>
// kernel: tpu_custom_call.1
= control target key start
LH: loop header
LB: loop body
LE: loop exit
PB: predicated region body
PF: predicated region fallthrough
CT: control target
= control target key end

     0   :  { %7 = vsyncpa [#allocation3], 0  ;;  %s312_s0 = inlined_call_operand.hbm [shape: f32[2,8,128], index: 0, kind: input, shape index: {}]   ;;  %s313_s1 = inlined_call_operand.hbm [shape: f32[2,8,128], index: 1, kind: input, shape index: {}]   ;;  %s314_s2 = inlined_call_operand.hbm [shape: f32[1,3,2,128], index: 2, kind: output, shape index: {}]  }
   0x1   :  { %8 = vsyncpa [#allocation6], 0 }
   0x2   :  { %9 = vsyncpa [#allocation4], 0  ;;  %s277_s9 = smov [#allocation2]  }
   0x3   :  { %s20_s10 = sshll.u32 %s277_s9, 4  ;;  %s21_s10 = int_to_ptr.vmem [resolvable:$true] %s20_s10 }
   0x4   :  { %s219_s11 = scalar_lea.vmem %s21_s10, 256  ;;  %p224_p1 = scmp.lt.s32.totalorder %s21_s10, %s21_s10 }
   0x5   :  { %p220_p0 = scmp.ne.s32.totalorder %s21_s10, %s219_s11  ;;  %p225_p2 = scmp.lt.s32.totalorder %s219_s11, %s219_s11 }
   0x7   :  { %p226_p3 = por %p225_p2, %p224_p1 }
   0x9   :  { %p227_p4 = pnand %p226_p3, %p220_p0 }
   0xb   :  { %230 = shalt.err (!%p227_p4)
}
   0xc   :  { %s278_s12 = smov 128   ;;  %s279_s13 = smov 8  }
   0xd   :  { %26 = dma.hbm_to_vmem [thread:$0]  %s312_s0, 256, %s21_s10, [#allocation3], %s278_s12, %s278_s12, %s279_s13  }
   0xe   :  { %s280_s16 = smov [#allocation5]  }
   0xf   :  { %s37_s17 = sshll.u32 %s280_s16, 4  ;;  %s38_s17 = int_to_ptr.vmem [resolvable:$true] %s37_s17 }
  0x10   :  { %s239_s18 = scalar_lea.vmem %s38_s17, 256  ;;  %p244_p6 = scmp.lt.s32.totalorder %s38_s17, %s38_s17 }
  0x11   :  { %p240_p5 = scmp.ne.s32.totalorder %s38_s17, %s239_s18  ;;  %p245_p7 = scmp.lt.s32.totalorder %s239_s18, %s239_s18 }
  0x13   :  { %p246_p8 = por %p245_p7, %p244_p6 }
  0x15   :  { %p247_p9 = pnand %p246_p8, %p240_p5 }
  0x17   :  { %250 = shalt.err (!%p247_p9)
}
  0x18   :  { %43 = dma.hbm_to_vmem [thread:$0]  %s313_s1, 256, %s38_s17, [#allocation6], %s278_s12, %s278_s12, %s279_s13  }
  0x19   :  { %271 = dma.done.wait [#allocation3], 256  }
  0x1a   :  { %272 = vsyncadd [#allocation3], 4294967040 }
  0x1b   :  { %273 = dma.done.wait [#allocation6], 256  }
  0x1c   :  { %274 = vsyncadd [#allocation6], 4294967040  ;;  %v281_v0 = vmov 0.0   ;;  %v63_v1 = vld [vmem:[#allocation2] sm:$0xff]  ;;  %v64_v2 = vld [vmem:[#allocation2 + $0x8] sm:$0xff]  ;;  %vm124_vm2 = vcmask 1041409  }
  0x1d   :  { %60 = vst [vmem:[#allocation7] sm:$0x3] %v281_v0  ;;  %61 = vst [vmem:[#allocation7 + $0x2] sm:$0x3] %v281_v0  ;;  %v67_v3 = vand.u32 2147483647, %v63_v1 }
  0x1e   :  { %62 = vst [vmem:[#allocation7 + $0x4] sm:$0x3] %v281_v0  ;;  %v68_v4 = vand.u32 2147483647, %v64_v2  ;;  %v65_v13 = vld [vmem:[#allocation5] sm:$0xff]  ;;  %v77_v15 = vmax.f32 %v63_v1, 0.0 }
  0x1f   :  { %v69_v5 = vsub.f32 0.0, %v67_v3  ;;  %v79_v16 = vmul.f32 %v65_v13, %v63_v1  ;;  %v66_v18 = vld [vmem:[#allocation5 + $0x8] sm:$0xff]  ;;  %vm91_vm0 = vcmp.ge.f32.partialorder %v63_v1, 0.0  ;;  %v78_v20 = vmax.f32 %v64_v2, 0.0  ;;  %s282_s0 = smov [#allocation7]  }
  0x20   :  { %v70_v6 = vsub.f32 0.0, %v68_v4  ;;  %v80_v21 = vmul.f32 %v66_v18, %v64_v2  ;;  %vm92_vm1 = vcmp.ge.f32.partialorder %v64_v2, 0.0  ;;  %s174_s1 = sshll.u32 %s282_s0, 4  ;;  %s175_s1 = int_to_ptr.vmem [resolvable:$true] %s174_s1 }
  0x21   :  { %v71_v7 = vmul.f32 1.442695, %v69_v5  ;;  %v81_v25 = vsub.f32 %v77_v15, %v79_v16  ;;  %s251_s21 = scalar_lea.vmem %s175_s1, 96  ;;  %p256_p11 = scmp.lt.s32.totalorder %s175_s1, %s175_s1 }
  0x22   :  { %v73_v8 = vmul.f32 1.442695, %v70_v6  ;;  %v82_v31 = vsub.f32 %v78_v20, %v80_v21  ;;  %p252_p10 = scmp.ne.s32.totalorder %s175_s1, %s251_s21  ;;  %p257_p12 = scmp.lt.s32.totalorder %s251_s21, %s251_s21 }
  0x23   :  { %199 = vpow2.f32 %v71_v7 }
  0x24   :  { %201 = vpow2.f32 %v73_v8  ;;  %v130_v7 = vld [vmem:[#allocation7 + $0x2] sm:$0x3]  ;;  %p258_p13 = por %p257_p12, %p256_p11 }
  0x26   :  { %p259_p0 = pnand %p258_p13, %p252_p10 }
  0x30   :  { %v200_v9 = vpop.eup %199 }
  0x31   :  { %v202_v10 = vpop.eup %201  ;;  %v75_v11 = vadd.f32 1.0, %v200_v9 }
  0x32   :  { %v76_v12 = vadd.f32 1.0, %v202_v10 }
  0x33   :  { %203 = vlog2.f32 %v75_v11 }
  0x34   :  { %205 = vrcp.f32 %v75_v11 }
  0x35   :  { %207 = vrcp.f32 %v76_v12 }
  0x36   :  { %209 = vlog2.f32 %v76_v12 }
  0x40   :  { %v204_v14 = vpop.eup %203 }
  0x41   :  { %v206_v17 = vpop.eup %205  ;;  %v84_v27 = vmul.f32 0.6931472, %v204_v14 }
  0x42   :  { %v208_v19 = vpop.eup %207  ;;  %v93_v22 = vmul.f32 %v206_v17, %v200_v9  ;;  %v150_v9 = vld [vmem:[#allocation7 + $0x4] sm:$0x3] }
  0x43   :  { %v210_v23 = vpop.eup %209  ;;  %v94_v24 = vmul.f32 %v208_v19, %v202_v10  ;;  %v87_v41 = vadd.f32 %v84_v27, %v81_v25 }
  0x44   :  { %v95_v26 = vsel %vm91_vm0, %v206_v17, %v93_v22  ;;  %v86_v32 = vmul.f32 0.6931472, %v210_v23  ;;  %v107_v22 = vld [vmem:[#allocation7] sm:$0x3] }
  0x45   :  { %v96_v28 = vsel %vm92_vm1, %v208_v19, %v94_v24  ;;  %v97_v29 = vmul.f32 %v95_v26, %v65_v13  ;;  %v99_v30 = vadd.f32 %v95_v26, %v65_v13 }
  0x46   :  { %v98_v33 = vmul.f32 %v96_v28, %v66_v18  ;;  %v100_v34 = vadd.f32 %v96_v28, %v66_v18  ;;  %v88_v45 = vadd.f32 %v86_v32, %v82_v31 }
  0x47   :  { %v101_v35 = vmul.f32 2.0, %v97_v29  ;;  %v131_v36 = vrot.slane %v97_v29, 4  ;;  %v151_v37 = vrot.slane %v99_v30, 4 }
  0x48   :  { %v102_v38 = vmul.f32 2.0, %v98_v33  ;;  %v137_v39 = vrot.slane %v98_v33, 4  ;;  %v157_v40 = vrot.slane %v100_v34, 4 }
  0x49   :  { %v103_v42 = vsub.f32 %v99_v30, %v101_v35  ;;  %v132_v43 = vadd.f32 %v131_v36, %v97_v29  ;;  %v152_v44 = vadd.f32 %v151_v37, %v99_v30 }
  0x4a   :  { %v104_v46 = vsub.f32 %v100_v34, %v102_v38  ;;  %v138_v47 = vadd.f32 %v137_v39, %v98_v33  ;;  %v158_v48 = vadd.f32 %v157_v40, %v100_v34 }
  0x4b   :  { %v105_v49 = vmul.f32 %v103_v42, %v103_v42  ;;  %v133_v50 = vrot.slane %v132_v43, 2  ;;  %v153_v51 = vrot.slane %v152_v44, 2 }
  0x4c   :  { %v106_v52 = vmul.f32 %v104_v46, %v104_v46  ;;  %v139_v53 = vrot.slane %v138_v47, 2  ;;  %v159_v54 = vrot.slane %v158_v48, 2 }
  0x4d   :  { %v108_v55 = vmul.f32 %v105_v49, %v87_v41  ;;  %v134_v56 = vadd.f32 %v133_v50, %v132_v43  ;;  %v154_v57 = vadd.f32 %v153_v51, %v152_v44 }
  0x4e   :  { %v109_v58 = vmul.f32 %v106_v52, %v88_v45  ;;  %v140_v59 = vadd.f32 %v139_v53, %v138_v47  ;;  %v160_v60 = vadd.f32 %v159_v54, %v158_v48 }
  0x4f   :  { %v110_v61 = vrot.slane %v108_v55, 4  ;;  %v135_v62 = vrot.slane %v134_v56, 1  ;;  %v155_v63 = vrot.slane %v154_v57, 1 }
  0x50   :  { %v116_v0 = vrot.slane %v109_v58, 4  ;;  %v141_v1 = vrot.slane %v140_v59, 1  ;;  %v161_v2 = vrot.slane %v160_v60, 1 }
  0x51   :  { %v111_v3 = vadd.f32 %v110_v61, %v108_v55  ;;  %v136_v4 = vadd.f32 %v135_v62, %v134_v56  ;;  %v156_v5 = vadd.f32 %v155_v63, %v154_v57 }
  0x52   :  { %v117_v6 = vadd.f32 %v116_v0, %v109_v58  ;;  %v142_v8 = vadd.f32 %v141_v1, %v140_v59  ;;  %v162_v10 = vadd.f32 %v161_v2, %v160_v60 }
  0x53   :  { %v112_v11 = vrot.slane %v111_v3, 2 }
  0x54   :  { %v118_v12 = vrot.slane %v117_v6, 2  ;;  %v145_v13 = vsel %vm124_vm2, %v142_v8, %v136_v4  ;;  %v165_v14 = vsel %vm124_vm2, %v162_v10, %v156_v5 }
  0x55   :  { %v113_v15 = vadd.f32 %v112_v11, %v111_v3  ;;  %v147_v16 = vadd.f32 %v145_v13, %v130_v7  ;;  %v167_v17 = vadd.f32 %v165_v14, %v150_v9 }
  0x56   :  { %v119_v18 = vadd.f32 %v118_v12, %v117_v6 }
  0x57   :  { %v114_v19 = vrot.slane %v113_v15, 1  ;;  %148 = vst [vmem:[#allocation7 + $0x2] sm:$0x3] %v147_v16  ;;  %168 = vst [vmem:[#allocation7 + $0x4] sm:$0x3] %v167_v17 }
  0x58   :  { %v120_v20 = vrot.slane %v119_v18, 1 }
  0x59   :  { %v115_v21 = vadd.f32 %v114_v19, %v113_v15 }
  0x5a   :  { %v121_v23 = vadd.f32 %v120_v20, %v119_v18 }
  0x5c   :  { %v125_v24 = vsel %vm124_vm2, %v121_v23, %v115_v21 }
  0x5d   :  { %v127_v25 = vadd.f32 %v125_v24, %v107_v22 }
  0x5f   :  { %128 = vst [vmem:[#allocation7] sm:$0x3] %v127_v25 }
  0x60   :  { %262 = shalt.err (!%p259_p0)
}
  0x61   :  { %s283_s22 = smov 32   ;;  %s284_s23 = smov 2  }
  0x62   :  { %180 = dma.vmem_to_hbm [thread:$0]  %s175_s1, 96, %s314_s2, [#allocation4], %s283_s22, %s283_s22, %s284_s23  }
  0x63   :  { %275 = dma.done.wait [#allocation4], 96  }
  0x64   :  { %276 = vsyncadd [#allocation4], 4294967200 }
  0x65   :  { %184 = vsyncpa [#allocation3], 1 }
  0x66   :  { %185 = vsyncpa [#allocation6], 1 }
  0x67   :  { %186 = vsyncpa [#allocation4], 1 }

</bundles_post_ra>
